<compile_context>
chip_gen: v5e
topology: v5e:2x2
jax: 0.10.0
libtpu: 0.0.40
codegen_flags: <defaults>
</compile_context>

<pallas_src>
import jax
import jax.numpy as jnp
from jax.experimental import pallas as pl
from jax.experimental.pallas import tpu as pltpu


def _preference_mlp_kernel(x_ref, w1_ref, w2_ref, w3_ref, vecs_ref, bn3_ref, o_ref):
    eps = 1e-5

    vecs = vecs_ref[...]                       # (H, 4) f32 columns: [g1, be1, g2, be2]
    g1, be1 = vecs[:, 0:1], vecs[:, 1:2]
    g2, be2 = vecs[:, 2:3], vecs[:, 3:4]

    def bn_relu(h, gamma, beta):
        # nn.BatchNorm1d (training-mode batch stats) folded to one scale+shift,
        # followed by ReLU.  h is (H, B): the stats are cross-lane reductions and
        # scale/shift are (H, 1) columns, so only mul+add+max touch the full (H, B).
        mu = jnp.mean(h, axis=1, keepdims=True)
        var = jnp.maximum(jnp.mean(h * h, axis=1, keepdims=True) - mu * mu, 0.0)
        scale = gamma * jax.lax.rsqrt(var + eps)
        shift = beta - mu * scale
        return jnp.maximum(h * scale + shift, 0.0)

    xT = x_ref[...]                            # (size, B) bf16, batch on lanes

    # Layer 1: Linear (bias cancelled by BN) -> BatchNorm1d -> ReLU
    h = jnp.dot(w1_ref[...], xT, preferred_element_type=jnp.float32)    # (H, B)
    h = bn_relu(h, g1, be1)

    # Layer 2: Linear (bias cancelled by BN) -> BatchNorm1d -> ReLU
    h = jnp.dot(w2_ref[...], h.astype(jnp.bfloat16),
                preferred_element_type=jnp.float32)                      # (H, B)
    h = bn_relu(h, g2, be2)

    # Layer 3: (1,H) x (H,B) -> lane-dense (1,B) logits, then BatchNorm1d(1)
    # (stats over the batch = over lanes) and Sigmoid.
    z = jnp.dot(w3_ref[...], h.astype(jnp.bfloat16),
                preferred_element_type=jnp.float32)                      # (1, B)
    mu = jnp.mean(z, axis=-1, keepdims=True)                             # (1, 1)
    var = jnp.maximum(jnp.mean(z * z, axis=-1, keepdims=True) - mu * mu, 0.0)
    scale = bn3_ref[0] * jax.lax.rsqrt(var + eps)
    shift = bn3_ref[1] - mu * scale
    o_ref[...] = jax.nn.sigmoid(z * scale + shift)                       # dense (1,B) store


def init_params(key, n_agents, n_items, hidden_dim):
    """PyTorch-default init of the underlying nn.Module (f32, with Linear biases)."""
    size = n_agents * n_items + n_agents * n_items + n_agents

    def linear_init(k, fan_in, fan_out):
        k_w, k_b = jax.random.split(k)
        bound = 1.0 / (fan_in ** 0.5)
        w = jax.random.uniform(k_w, (fan_in, fan_out), jnp.float32, -bound, bound)
        b = jax.random.uniform(k_b, (fan_out,), jnp.float32, -bound, bound)
        return w, b

    k1, k2, k3 = jax.random.split(key, 3)
    w1, b1 = linear_init(k1, size, hidden_dim)
    w2, b2 = linear_init(k2, hidden_dim, hidden_dim)
    w3, b3 = linear_init(k3, hidden_dim, 1)

    # BatchNorm affine params: gamma=1, beta=0 (PyTorch default).
    g1 = jnp.ones((hidden_dim,), jnp.float32)
    be1 = jnp.zeros((hidden_dim,), jnp.float32)
    g2 = jnp.ones((hidden_dim,), jnp.float32)
    be2 = jnp.zeros((hidden_dim,), jnp.float32)
    g3 = jnp.ones((1,), jnp.float32)
    be3 = jnp.zeros((1,), jnp.float32)

    return dict(w1=w1, b1=b1, g1=g1, be1=be1,
                w2=w2, b2=b2, g2=g2, be2=be2,
                w3=w3, b3=b3, g3=g3, be3=be3)


def pack_kernel_params(p):
    """Kernel-side parameter layout: bf16 weights in PyTorch (out, in) orientation
    (so all layers are plain matmuls on (hidden, batch) activations), Linear biases
    dropped (exactly cancelled by BatchNorm), BN vectors packed column-wise into one
    (H, 4) f32 array, BN3 scalars in a (2,) SMEM array."""
    w1t = p["w1"].T.astype(jnp.bfloat16)       # (H, size)
    w2t = p["w2"].T.astype(jnp.bfloat16)       # (H, H)
    w3t = p["w3"].T.astype(jnp.bfloat16)       # (1, H)
    vecs = jnp.stack([p["g1"], p["be1"], p["g2"], p["be2"]],
                     axis=1).astype(jnp.float32)                       # (H, 4)
    bn3 = jnp.concatenate([p["g3"], p["be3"]]).astype(jnp.float32)     # (2,)
    return w1t, w2t, w3t, vecs, bn3


def preference_net_forward(bids, allocs, payments, kernel_params):
    w1t, w2t, w3t, vecs, bn3 = kernel_params
    B = bids.shape[0]

    # Glue: flatten + concat (matches torch.cat([bids, allocs, payments], dim=1)),
    # emitted already transposed so batch lands on lanes inside the kernel.
    data_t = jnp.concatenate(
        [bids.reshape(B, -1).T, allocs.reshape(B, -1).T, payments.reshape(B, -1).T],
        axis=0).astype(jnp.bfloat16)                                   # (size, B)

    vmem = pl.BlockSpec(memory_space=pltpu.MemorySpace.VMEM)
    smem = pl.BlockSpec(memory_space=pltpu.MemorySpace.SMEM)

    out_row = pl.pallas_call(
        _preference_mlp_kernel,
        out_shape=jax.ShapeDtypeStruct((1, B), jnp.float32),           # lane-dense slab
        in_specs=[vmem, vmem, vmem, vmem, vmem, smem],
        out_specs=vmem,
        compiler_params=pltpu.CompilerParams(
            vmem_limit_bytes=32 * 1024 * 1024),
    )(data_t, w1t, w2t, w3t, vecs, bn3)

    # The .squeeze(-1) of the PyTorch forward (output was computed batch-on-lanes).
    return out_row[0, :]


def preference_net_reference(bids, allocs, payments, p):
    """Pure-JAX f32 reference matching the PyTorch module exactly (with biases)."""
    B = bids.shape[0]
    x = jnp.concatenate(
        [bids.reshape(B, -1), allocs.reshape(B, -1), payments.reshape(B, -1)],
        axis=1).astype(jnp.float32)

    def bn(h, g, b):
        mu = jnp.mean(h, axis=0, keepdims=True)
        var = jnp.mean((h - mu) ** 2, axis=0, keepdims=True)
        return g * (h - mu) * jax.lax.rsqrt(var + 1e-5) + b

    h = jnp.maximum(bn(x @ p["w1"] + p["b1"], p["g1"], p["be1"]), 0.0)
    h = jnp.maximum(bn(h @ p["w2"] + p["b2"], p["g2"], p["be2"]), 0.0)
    h = bn(h @ p["w3"] + p["b3"], p["g3"], p["be3"])
    return jax.nn.sigmoid(h)[:, 0]


if __name__ == "__main__":
    B, n_agents, n_items, hidden_dim = 8, 2, 3, 32

    key = jax.random.PRNGKey(0)
    k_bids, k_allocs, k_pay, k_params = jax.random.split(key, 4)

    bids = jax.random.uniform(k_bids, (B, n_agents, n_items), jnp.float32)
    allocs = jax.random.uniform(k_allocs, (B, n_agents, n_items), jnp.float32)
    payments = jax.random.uniform(k_pay, (B, n_agents), jnp.float32)

    raw_params = init_params(k_params, n_agents, n_items, hidden_dim)
    kernel_params = pack_kernel_params(raw_params)

    out = preference_net_forward(bids, allocs, payments, kernel_params)
    out = jax.block_until_ready(out)

    assert out.shape == (B,)
    assert bool(jnp.all(jnp.isfinite(out)))

    # Loose tolerance: kernel runs bf16 matmuls (and drops the BN-cancelled biases);
    # reference is full f32 with biases.
    ref = preference_net_reference(bids, allocs, payments, raw_params)
    assert bool(jnp.allclose(out, ref, atol=0.1))

    print("KERNEL_OK")
</pallas_src>

<mosaic_0001>
module attributes {stable_mosaic.version = 11 : i64} {
  func.func @_preference_mlp_kernel(%arg0: memref<14x8xbf16, #tpu.memory_space<vmem>>, %arg1: memref<32x14xbf16, #tpu.memory_space<vmem>>, %arg2: memref<32x32xbf16, #tpu.memory_space<vmem>>, %arg3: memref<1x32xbf16, #tpu.memory_space<vmem>>, %arg4: memref<32x4xf32, #tpu.memory_space<vmem>>, %arg5: memref<2xf32, #tpu.memory_space<smem>>, %arg6: memref<1x8xf32, #tpu.memory_space<vmem>>) attributes {dimension_semantics = [], scalar_prefetch = 0 : i64, scratch_operands = 0 : i64, tpu.core_type = #tpu.core_type<tc>} {
    %c0 = arith.constant 0 : index
    %c0_0 = arith.constant 0 : index
    %0 = vector.load %arg4[%c0, %c0_0] : memref<32x4xf32, #tpu.memory_space<vmem>>, vector<32x4xf32>
    %1 = vector.extract_strided_slice %0 {offsets = [0, 0], sizes = [32, 1], strides = [1, 1]} : vector<32x4xf32> to vector<32x1xf32>
    %2 = vector.extract_strided_slice %0 {offsets = [0, 1], sizes = [32, 1], strides = [1, 1]} : vector<32x4xf32> to vector<32x1xf32>
    %3 = vector.extract_strided_slice %0 {offsets = [0, 2], sizes = [32, 1], strides = [1, 1]} : vector<32x4xf32> to vector<32x1xf32>
    %4 = vector.extract_strided_slice %0 {offsets = [0, 3], sizes = [32, 1], strides = [1, 1]} : vector<32x4xf32> to vector<32x1xf32>
    %c0_1 = arith.constant 0 : index
    %c0_2 = arith.constant 0 : index
    %5 = vector.load %arg0[%c0_1, %c0_2] : memref<14x8xbf16, #tpu.memory_space<vmem>>, vector<14x8xbf16>
    %c0_3 = arith.constant 0 : index
    %c0_4 = arith.constant 0 : index
    %6 = vector.load %arg1[%c0_3, %c0_4] : memref<32x14xbf16, #tpu.memory_space<vmem>>, vector<32x14xbf16>
    %cst = arith.constant dense<0.000000e+00> : vector<32x8xf32>
    %7 = tpu.matmul %6, %5, %cst {dimension_numbers = #tpu.dot_dimension_numbers<[1], [0], [0], [1], [0, 0, 1, 1], [], []>} : vector<32x14xbf16>, vector<14x8xbf16>, vector<32x8xf32> -> vector<32x8xf32>
    %cst_5 = arith.constant dense<0.000000e+00> : vector<32xf32>
    %8 = vector.multi_reduction <add>, %7, %cst_5 [1] : vector<32x8xf32> to vector<32xf32>
    %9 = vector.shape_cast %8 : vector<32xf32> to vector<32x1xf32>
    %cst_6 = arith.constant 8.000000e+00 : f32
    %10 = vector.broadcast %cst_6 : f32 to vector<32x1xf32>
    %11 = arith.divf %9, %10 : vector<32x1xf32>
    %12 = arith.mulf %7, %7 : vector<32x8xf32>
    %cst_7 = arith.constant dense<0.000000e+00> : vector<32xf32>
    %13 = vector.multi_reduction <add>, %12, %cst_7 [1] : vector<32x8xf32> to vector<32xf32>
    %14 = vector.shape_cast %13 : vector<32xf32> to vector<32x1xf32>
    %cst_8 = arith.constant 8.000000e+00 : f32
    %15 = vector.broadcast %cst_8 : f32 to vector<32x1xf32>
    %16 = arith.divf %14, %15 : vector<32x1xf32>
    %17 = arith.mulf %11, %11 : vector<32x1xf32>
    %18 = arith.subf %16, %17 : vector<32x1xf32>
    %cst_9 = arith.constant 0.000000e+00 : f32
    %19 = vector.broadcast %cst_9 : f32 to vector<32x1xf32>
    %20 = arith.maximumf %18, %19 : vector<32x1xf32>
    %cst_10 = arith.constant 9.99999974E-6 : f32
    %21 = vector.broadcast %cst_10 : f32 to vector<32x1xf32>
    %22 = arith.addf %20, %21 : vector<32x1xf32>
    %23 = math.rsqrt %22 : vector<32x1xf32>
    %24 = arith.mulf %1, %23 : vector<32x1xf32>
    %25 = arith.mulf %11, %24 : vector<32x1xf32>
    %26 = arith.subf %2, %25 : vector<32x1xf32>
    %27 = vector.broadcast %24 : vector<32x1xf32> to vector<32x8xf32>
    %28 = arith.mulf %7, %27 : vector<32x8xf32>
    %29 = vector.broadcast %26 : vector<32x1xf32> to vector<32x8xf32>
    %30 = arith.addf %28, %29 : vector<32x8xf32>
    %cst_11 = arith.constant 0.000000e+00 : f32
    %31 = vector.broadcast %cst_11 : f32 to vector<32x8xf32>
    %32 = arith.maximumf %30, %31 : vector<32x8xf32>
    %c0_12 = arith.constant 0 : index
    %c0_13 = arith.constant 0 : index
    %33 = vector.load %arg2[%c0_12, %c0_13] : memref<32x32xbf16, #tpu.memory_space<vmem>>, vector<32x32xbf16>
    %34 = arith.truncf %32 : vector<32x8xf32> to vector<32x8xbf16>
    %cst_14 = arith.constant dense<0.000000e+00> : vector<32x8xf32>
    %35 = tpu.matmul %33, %34, %cst_14 {dimension_numbers = #tpu.dot_dimension_numbers<[1], [0], [0], [1], [0, 0, 1, 1], [], []>} : vector<32x32xbf16>, vector<32x8xbf16>, vector<32x8xf32> -> vector<32x8xf32>
    %cst_15 = arith.constant dense<0.000000e+00> : vector<32xf32>
    %36 = vector.multi_reduction <add>, %35, %cst_15 [1] : vector<32x8xf32> to vector<32xf32>
    %37 = vector.shape_cast %36 : vector<32xf32> to vector<32x1xf32>
    %cst_16 = arith.constant 8.000000e+00 : f32
    %38 = vector.broadcast %cst_16 : f32 to vector<32x1xf32>
    %39 = arith.divf %37, %38 : vector<32x1xf32>
    %40 = arith.mulf %35, %35 : vector<32x8xf32>
    %cst_17 = arith.constant dense<0.000000e+00> : vector<32xf32>
    %41 = vector.multi_reduction <add>, %40, %cst_17 [1] : vector<32x8xf32> to vector<32xf32>
    %42 = vector.shape_cast %41 : vector<32xf32> to vector<32x1xf32>
    %cst_18 = arith.constant 8.000000e+00 : f32
    %43 = vector.broadcast %cst_18 : f32 to vector<32x1xf32>
    %44 = arith.divf %42, %43 : vector<32x1xf32>
    %45 = arith.mulf %39, %39 : vector<32x1xf32>
    %46 = arith.subf %44, %45 : vector<32x1xf32>
    %cst_19 = arith.constant 0.000000e+00 : f32
    %47 = vector.broadcast %cst_19 : f32 to vector<32x1xf32>
    %48 = arith.maximumf %46, %47 : vector<32x1xf32>
    %cst_20 = arith.constant 9.99999974E-6 : f32
    %49 = vector.broadcast %cst_20 : f32 to vector<32x1xf32>
    %50 = arith.addf %48, %49 : vector<32x1xf32>
    %51 = math.rsqrt %50 : vector<32x1xf32>
    %52 = arith.mulf %3, %51 : vector<32x1xf32>
    %53 = arith.mulf %39, %52 : vector<32x1xf32>
    %54 = arith.subf %4, %53 : vector<32x1xf32>
    %55 = vector.broadcast %52 : vector<32x1xf32> to vector<32x8xf32>
    %56 = arith.mulf %35, %55 : vector<32x8xf32>
    %57 = vector.broadcast %54 : vector<32x1xf32> to vector<32x8xf32>
    %58 = arith.addf %56, %57 : vector<32x8xf32>
    %cst_21 = arith.constant 0.000000e+00 : f32
    %59 = vector.broadcast %cst_21 : f32 to vector<32x8xf32>
    %60 = arith.maximumf %58, %59 : vector<32x8xf32>
    %c0_22 = arith.constant 0 : index
    %c0_23 = arith.constant 0 : index
    %61 = vector.load %arg3[%c0_22, %c0_23] : memref<1x32xbf16, #tpu.memory_space<vmem>>, vector<1x32xbf16>
    %62 = arith.truncf %60 : vector<32x8xf32> to vector<32x8xbf16>
    %cst_24 = arith.constant dense<0.000000e+00> : vector<1x8xf32>
    %63 = tpu.matmul %61, %62, %cst_24 {dimension_numbers = #tpu.dot_dimension_numbers<[1], [0], [0], [1], [0, 0, 1, 1], [], []>} : vector<1x32xbf16>, vector<32x8xbf16>, vector<1x8xf32> -> vector<1x8xf32>
    %cst_25 = arith.constant dense<0.000000e+00> : vector<1xf32>
    %64 = vector.multi_reduction <add>, %63, %cst_25 [1] : vector<1x8xf32> to vector<1xf32>
    %65 = vector.shape_cast %64 : vector<1xf32> to vector<1x1xf32>
    %cst_26 = arith.constant 8.000000e+00 : f32
    %66 = vector.broadcast %cst_26 : f32 to vector<1x1xf32>
    %67 = arith.divf %65, %66 : vector<1x1xf32>
    %68 = arith.mulf %63, %63 : vector<1x8xf32>
    %cst_27 = arith.constant dense<0.000000e+00> : vector<1xf32>
    %69 = vector.multi_reduction <add>, %68, %cst_27 [1] : vector<1x8xf32> to vector<1xf32>
    %70 = vector.shape_cast %69 : vector<1xf32> to vector<1x1xf32>
    %cst_28 = arith.constant 8.000000e+00 : f32
    %71 = vector.broadcast %cst_28 : f32 to vector<1x1xf32>
    %72 = arith.divf %70, %71 : vector<1x1xf32>
    %73 = arith.mulf %67, %67 : vector<1x1xf32>
    %74 = arith.subf %72, %73 : vector<1x1xf32>
    %cst_29 = arith.constant 0.000000e+00 : f32
    %75 = vector.broadcast %cst_29 : f32 to vector<1x1xf32>
    %76 = arith.maximumf %74, %75 : vector<1x1xf32>
    %c0_30 = arith.constant 0 : index
    %77 = memref.load %arg5[%c0_30] : memref<2xf32, #tpu.memory_space<smem>>
    %cst_31 = arith.constant 9.99999974E-6 : f32
    %78 = vector.broadcast %cst_31 : f32 to vector<1x1xf32>
    %79 = arith.addf %76, %78 : vector<1x1xf32>
    %80 = math.rsqrt %79 : vector<1x1xf32>
    %81 = vector.broadcast %77 : f32 to vector<1x1xf32>
    %82 = arith.mulf %81, %80 : vector<1x1xf32>
    %c1 = arith.constant 1 : index
    %83 = memref.load %arg5[%c1] : memref<2xf32, #tpu.memory_space<smem>>
    %84 = arith.mulf %67, %82 : vector<1x1xf32>
    %85 = vector.broadcast %83 : f32 to vector<1x1xf32>
    %86 = arith.subf %85, %84 : vector<1x1xf32>
    %87 = vector.broadcast %82 : vector<1x1xf32> to vector<1x8xf32>
    %88 = arith.mulf %63, %87 : vector<1x8xf32>
    %89 = vector.broadcast %86 : vector<1x1xf32> to vector<1x8xf32>
    %90 = arith.addf %88, %89 : vector<1x8xf32>
    %91 = arith.negf %90 : vector<1x8xf32>
    %92 = math.exp %91 : vector<1x8xf32>
    %cst_32 = arith.constant 1.000000e+00 : f32
    %93 = vector.broadcast %cst_32 : f32 to vector<1x8xf32>
    %94 = arith.addf %93, %92 : vector<1x8xf32>
    %95 = arith.divf %93, %94 : vector<1x8xf32>
    %c0_33 = arith.constant 0 : index
    %c0_34 = arith.constant 0 : index
    %96 = vector.load %arg6[%c0_33, %c0_34] : memref<1x8xf32, #tpu.memory_space<vmem>>, vector<1x8xf32>
    tpu.vector_store %arg6[%c0_33, %c0_34], %95 {strides = array<i32>} : memref<1x8xf32, #tpu.memory_space<vmem>>, vector<1x8xf32>,
    return
  }
}

</mosaic_0001>

<bundles_post_ra>
// kernel: tpu_custom_call.1
= control target key start
LH: loop header
LB: loop body
LE: loop exit
PB: predicated region body
PF: predicated region fallthrough
CT: control target
= control target key end

     0   :  { %11 = vsyncpa [#allocation4], 0  ;;  %s930_s0 = inlined_call_operand.vmem [shape: bf16[14,8], index: 0, kind: input, shape index: {}]   ;;  %s931_s1 = inlined_call_operand.vmem [shape: bf16[32,14], index: 1, kind: input, shape index: {}]   ;;  %s932_s2 = inlined_call_operand.vmem [shape: bf16[32,32], index: 2, kind: input, shape index: {}]   ;;  %s933_s3 = inlined_call_operand.vmem [shape: bf16[1,32], index: 3, kind: input, shape index: {}]   ;;  %s934_s4 = inlined_call_operand.vmem [shape: f32[32,4], index: 4, kind: input, shape index: {}]   ;;  %s935_s5 = inlined_call_operand.vmem [shape: f32[2], index: 5, kind: input, shape index: {}]   ;;  %s936_s6 = inlined_call_operand.hbm [shape: f32[1,8], index: 6, kind: output, shape index: {}]  }
   0x1   :  { %12 = vsyncpa [#allocation3], 0  ;;  %s28_s23 = sshll.u32 %s935_s5, 4  ;;  %s693_s24 = smov [#allocation2]   ;;  %s29_s23 = int_to_ptr.vmem [resolvable:$true] %s28_s23 }
   0x2   :  { %31 = dma.vmem_to_smem %s29_s23, 16, %s693_s24, [#allocation4]  }
   0x3   :  { %689 = dma.done.wait [#allocation4], 16  }
   0x4   :  { %690 = vsyncadd [#allocation4], 4294967280 }
   0x5   :  { %36 = sfence }
   0x6   :  { %v586_v0 = vld [vmem:[%s930_s0] sm:$0xf]  ;;  %v603_v1 = vld [vmem:[%s930_s0] sm:$0x70]  ;;  %vm70_vm0 = vcmask 1046528   ;;  %vm63_vm1 = vcmask 113664  }
   0x7   :  { %v587_v2 = vor.u32 %v603_v1, %v586_v0  ;;  %v604_v4 = vld [vmem:[%s931_s1] sm:$0xff]  ;;  %v605_v5 = vld [vmem:[%s931_s1 + $0x8] sm:$0xff]  ;;  %vm93_vm2 = vcmask 64512   ;;  %v694_v22 = vmov 8.0   ;;  %v695_v49 = vmov 0   ;;  %s696_s8 = smov 1  }
   0x8   :  { %629 = vrcp.f32 %v694_v22  ;;  %618 = vset.pattern.permute.xlu0 %v695_v49  ;;  %620 = vset.pattern.permute.xlu1 %v695_v49  ;;  %v811_v22 = vld [vmem:[%s934_s4 + $0x18] sm:$0xff]  ;;  %s601_s19 = sld [smem:[#allocation2 + $0x1]]  ;;  %s700_s20 = smov [#allocation5]  }
   0x9   :  { %v72_v3 = vsel %vm70_vm0, %v587_v2, 0  ;;  %619 = vset.pattern.permute.xlu2 %v695_v49  ;;  %vm289_vm0 = vcmask 261120   ;;  %s564_s21 = sshll.u32 %s700_s20, 4  ;;  %s566_s24 = sshll.u32 %s936_s6, 4  ;;  %s565_s21 = int_to_ptr.vmem [resolvable:$true] %s564_s21  ;;  %s567_s24 = int_to_ptr.hbm [resolvable:$true] %s566_s24 }
   0xa   :  { %81 = vmatpush.bf16.msra.mxu0 %v72_v3 }
   0xd   :  { %588 = vmatmul.msk.bf16.vlgmr.msra.gmra.mxu0 %vm63_vm1, %v604_v4 }
   0xe   :  { %v630_v23 = vpop.eup %629 }
   0xf   :  { %v107_v24 = vmul.f32 8.0, %v630_v23  ;;  %vm111_vm3 = vweird.f32 %v630_v23 }
  0x11   :  { %v108_v25 = vsub.f32 1.0, %v107_v24 }
  0x13   :  { %v109_v26 = vmul.f32 %v630_v23, %v108_v25 }
  0x15   :  { %v110_v27 = vadd.f32 %v630_v23, %v109_v26 }
  0x17   :  { %v779_v28 = vsel %vm111_vm3, %v630_v23, %v110_v27 }
  0x1d   :  { %589 = vmatmul.msk.bf16.gmra.mxu0 %vm63_vm1, %v605_v5  ;;  %v804_v5 = vld [vmem:[%s934_s4 + $0x10] sm:$0xff] }
  0x8a   :  { %v751_v6 = vpop.f32.mrf.mxu0 }
  0x8b   :  { %v94_v7 = vsel %vm93_vm2, %v751_v6, 0.0  ;;  %v117_v18 = vmul.f32 %v751_v6, %v751_v6 }
  0x8c   :  { %95 = vadd.xlane.f32.xlu2 %v94_v7 }
  0x8d   :  { %v121_v20 = vsel %vm93_vm2, %v117_v18, 0.0 }
  0x92   :  { %v755_v8 = vpop.f32.mrf.mxu0 }
  0x93   :  { %v97_v9 = vsel %vm93_vm2, %v755_v8, 0.0  ;;  %v118_v19 = vmul.f32 %v755_v8, %v755_v8 }
  0x94   :  { %98 = vadd.xlane.f32.xlu2 %v97_v9 }
  0x95   :  { %v124_v21 = vsel %vm93_vm2, %v118_v19, 0.0 }
  0x9a   :  { %v759_v10 = vpop.f32.mrf.mxu0 }
  0x9b   :  { %v100_v11 = vsel %vm93_vm2, %v759_v10, 0.0  ;;  %v119_v12 = vmul.f32 %v759_v10, %v759_v10 }
  0x9c   :  { %101 = vadd.xlane.f32.xlu0 %v100_v11 }
  0x9d   :  { %v127_v13 = vsel %vm93_vm2, %v119_v12, 0.0 }
  0x9e   :  { %128 = vadd.xlane.f32.xlu1 %v127_v13 }
  0xa2   :  { %v766_v14 = vpop.f32.mrf.mxu0 }
  0xa3   :  { %v120_v15 = vmul.f32 %v766_v14, %v766_v14  ;;  %v103_v16 = vsel %vm93_vm2, %v766_v14, 0.0 }
  0xa4   :  { %104 = vadd.xlane.f32.xlu0 %v103_v16 }
  0xa5   :  { %v130_v17 = vsel %vm93_vm2, %v120_v15, 0.0 }
  0xa6   :  { %131 = vadd.xlane.f32.xlu1 %v130_v17 }
  0xac   :  { %122 = vadd.xlane.f32.xlu0 %v121_v20 }
  0xae   :  { %125 = vadd.xlane.f32.xlu1 %v124_v21 }
  0xff   :  { %v96_v31 = vpop.xlane.xlu2 %95 }
 0x100   :  { %v790_v44 = vmul.f32 %v779_v28, %v96_v31 }
 0x102   :  { %v137_v51 = vmul.f32 %v790_v44, %v790_v44 }
 0x107   :  { %v99_v43 = vpop.xlane.xlu2 %98 }
 0x108   :  { %v793_v46 = vmul.f32 %v779_v28, %v99_v43  ;;  %v697_v43 = vmov 1  }
 0x10a   :  { %v138_v56 = vmul.f32 %v793_v46, %v793_v46 }
 0x10f   :  { %v102_v29 = vpop.xlane.xlu0 %101 }
 0x110   :  { %v115_v30 = vmul.f32 %v779_v28, %v102_v29 }
 0x111   :  { %v129_v32 = vpop.xlane.xlu1 %128 }
 0x112   :  { %v139_v33 = vmul.f32 %v115_v30, %v115_v30  ;;  %v135_v34 = vmul.f32 %v129_v32, %v779_v28 }
 0x114   :  { %v143_v35 = vsub.f32 %v135_v34, %v139_v33  ;;  %v818_v33 = vld [vmem:[%s934_s4] sm:$0xff] }
 0x116   :  { %v147_v36 = vmax.f32 %v143_v35, 0.0 }
 0x117   :  { %v105_v37 = vpop.xlane.xlu0 %104 }
 0x118   :  { %v151_v38 = vadd.f32 1e-05, %v147_v36  ;;  %v784_v39 = vmul.f32 %v779_v28, %v105_v37  ;;  %v824_v36 = vld [vmem:[%s934_s4 + $0x8] sm:$0xff] }
 0x119   :  { %v132_v40 = vpop.xlane.xlu1 %131 }
 0x11a   :  { %631 = vrsqrt.f32 %v151_v38  ;;  %v140_v41 = vmul.f32 %v784_v39, %v784_v39  ;;  %v136_v42 = vmul.f32 %v132_v40, %v779_v28  ;;  %vm179_vm5 = vweird.f32 %v151_v38 }
 0x11c   :  { %v144_v45 = vsub.f32 %v136_v42, %v140_v41 }
 0x11e   :  { %v148_v47 = vmax.f32 %v144_v45, 0.0 }
 0x11f   :  { %v123_v48 = vpop.xlane.xlu0 %122 }
 0x120   :  { %v632_v50 = vpop.eup %631  ;;  %v152_v52 = vadd.f32 1e-05, %v148_v47  ;;  %v133_v53 = vmul.f32 %v123_v48, %v779_v28 }
 0x121   :  { %v174_v54 = vmul.f32 %v632_v50, %v151_v38  ;;  %v126_v55 = vpop.xlane.xlu1 %125  ;;  %vm180_vm4 = vweird.f32 %v632_v50 }
 0x122   :  { %633 = vrsqrt.f32 %v152_v52  ;;  %v141_v57 = vsub.f32 %v133_v53, %v137_v51  ;;  %v134_v58 = vmul.f32 %v126_v55, %v779_v28  ;;  %vm181_vm6 = vmor %vm179_vm5, %vm180_vm4  ;;  %vm189_vm8 = vweird.f32 %v152_v52 }
 0x123   :  { %v175_v59 = vmul.f32 %v632_v50, %v174_v54 }
 0x124   :  { %v145_v60 = vmax.f32 %v141_v57, 0.0  ;;  %v142_v61 = vsub.f32 %v134_v58, %v138_v56 }
 0x125   :  { %v176_v62 = vmul.f32 0.5, %v175_v59 }
 0x126   :  { %v149_v63 = vadd.f32 1e-05, %v145_v60  ;;  %v146_v0 = vmax.f32 %v142_v61, 0.0 }
 0x127   :  { %v177_v1 = vsub.f32 1.5, %v176_v62 }
 0x128   :  { %v634_v2 = vpop.eup %633  ;;  %635 = vrsqrt.f32 %v149_v63  ;;  %v150_v3 = vadd.f32 1e-05, %v146_v0  ;;  %vm159_vm11 = vweird.f32 %v149_v63 }
 0x129   :  { %v184_v4 = vmul.f32 %v634_v2, %v152_v52  ;;  %v178_v7 = vmul.f32 %v632_v50, %v177_v1  ;;  %vm190_vm7 = vweird.f32 %v634_v2 }
 0x12a   :  { %637 = vrsqrt.f32 %v150_v3  ;;  %vm191_vm9 = vmor %vm189_vm8, %vm190_vm7  ;;  %vm169_vm14 = vweird.f32 %v150_v3 }
 0x12b   :  { %v185_v9 = vmul.f32 %v634_v2, %v184_v4  ;;  %v182_v11 = vsel %vm181_vm6, %v632_v50, %v178_v7 }
 0x12c   :  { %v195_v12 = vmul.f32 %v182_v11, %v804_v5 }
 0x12d   :  { %v186_v13 = vmul.f32 0.5, %v185_v9 }
 0x12e   :  { %v636_v15 = vpop.eup %635  ;;  %v199_v16 = vmul.f32 %v195_v12, %v115_v30 }
 0x12f   :  { %v187_v17 = vsub.f32 1.5, %v186_v13  ;;  %v154_v18 = vmul.f32 %v636_v15, %v149_v63  ;;  %vm160_vm10 = vweird.f32 %v636_v15  ;;  %v607_v13 = vld [vmem:[%s932_s2 + $0x8] sm:$0xff] }
 0x130   :  { %v638_v19 = vpop.eup %637  ;;  %209 = vrot.lane.b32.xlu2 %v199_v16, %s696_s8  ;;  %vm161_vm13 = vmor %vm159_vm11, %vm160_vm10 }
 0x131   :  { %v155_v20 = vmul.f32 %v636_v15, %v154_v18  ;;  %v164_v21 = vmul.f32 %v638_v19, %v150_v3  ;;  %v188_v23 = vmul.f32 %v634_v2, %v187_v17  ;;  %vm170_vm12 = vweird.f32 %v638_v19 }
 0x132   :  { %vm171_vm15 = vmor %vm169_vm14, %vm170_vm12 }
 0x133   :  { %v156_v24 = vmul.f32 0.5, %v155_v20  ;;  %v165_v25 = vmul.f32 %v638_v19, %v164_v21  ;;  %v192_v26 = vsel %vm191_vm9, %v634_v2, %v188_v23 }
 0x134   :  { %v196_v27 = vmul.f32 %v192_v26, %v811_v22 }
 0x135   :  { %v157_v29 = vsub.f32 1.5, %v156_v24  ;;  %v166_v30 = vmul.f32 0.5, %v165_v25 }
 0x136   :  { %v200_v31 = vmul.f32 %v196_v27, %v784_v39 }
 0x137   :  { %v167_v32 = vsub.f32 1.5, %v166_v30  ;;  %v158_v34 = vmul.f32 %v636_v15, %v157_v29 }
 0x138   :  { %211 = vrot.lane.b32.xlu0 %v200_v31, %s696_s8 }
 0x139   :  { %v162_v35 = vsel %vm161_vm13, %v636_v15, %v158_v34  ;;  %v168_v37 = vmul.f32 %v638_v19, %v167_v32  ;;  %vm506_vm13 = vcmask 57344  }
 0x13a   :  { %v193_v38 = vmul.f32 %v162_v35, %v818_v33 }
 0x13b   :  { %v172_v39 = vsel %vm171_vm15, %v638_v19, %v168_v37 }
 0x13c   :  { %v197_v40 = vmul.f32 %v193_v38, %v790_v44  ;;  %v194_v41 = vmul.f32 %v172_v39, %v824_v36 }
 0x13e   :  { %205 = vrot.lane.b32.xlu1 %v197_v40, %s696_s8  ;;  %v198_v42 = vmul.f32 %v194_v41, %v793_v46 }
 0x140   :  { %233 = vperm.xlu0 %618, %v195_v12   ;;  %207 = vrot.lane.b32.xlu2 %v198_v42, %s696_s8  ;;  %v606_v12 = vld [vmem:[%s932_s2] sm:$0xff] }
 0x146   :  { %223 = vperm.xlu1 %620, %v193_v38  }
 0x148   :  { %228 = vperm.xlu0 %618, %v194_v41   ;;  %238 = vperm.xlu2 %619, %v196_v27  }
 0x14e   :  { %621 = vset.pattern.permute.xlu1 %v697_v43 }
 0x150   :  { %622 = vset.pattern.permute.xlu2 %v697_v43 }
 0x18a   :  { %v210_v45 = vpop.permute.xlu2 %209 }
 0x18b   :  { %v219_v47 = vsub.f32 %v804_v5, %v210_v45  ;;  %v698_v45 = vmov 2  }
 0x18d   :  { %257 = vperm.xlu1 %621, %v219_v47  }
 0x19a   :  { %v208_v44 = vpop.permute.xlu2 %207 }
 0x19b   :  { %v218_v48 = vsub.f32 %v824_v36, %v208_v44 }
 0x19d   :  { %252 = vperm.xlu1 %621, %v218_v48  }
 0x1a2   :  { %v239_v53 = vpop.permute.xlu2 %238 }
 0x1a3   :  { %v244_v57 = vmul.f32 %v239_v53, %v766_v14 }
 0x1a5   :  { %623 = vset.pattern.permute.xlu1 %v698_v45 }
 0x1aa   :  { %v212_v49 = vpop.permute.xlu0 %211 }
 0x1ab   :  { %v220_v46 = vsub.f32 %v811_v22, %v212_v49 }
 0x1ad   :  { %262 = vperm.xlu2 %622, %v220_v46  }
 0x1b0   :  { %v206_v50 = vpop.permute.xlu1 %205 }
 0x1b1   :  { %v217_v51 = vsub.f32 %v818_v33, %v206_v50 }
 0x1b2   :  { %v234_v54 = vpop.permute.xlu0 %233 }
 0x1b3   :  { %v243_v56 = vmul.f32 %v234_v54, %v759_v10 }
 0x1b5   :  { %247 = vperm.xlu2 %622, %v217_v51  }
 0x1b8   :  { %v224_v52 = vpop.permute.xlu1 %223 }
 0x1b9   :  { %v241_v1 = vmul.f32 %v224_v52, %v751_v6 }
 0x1ba   :  { %v229_v63 = vpop.permute.xlu0 %228 }
 0x1bb   :  { %v242_v2 = vmul.f32 %v229_v63, %v755_v8 }
 0x1bd   :  { %624 = vset.pattern.permute.xlu2 %v698_v45 }
 0x1ff   :  { %v258_v55 = vpop.permute.xlu1 %257 }
 0x200   :  { %v267_v58 = vadd.f32 %v258_v55, %v243_v56 }
 0x202   :  { %v271_v61 = vmax.f32 %v267_v58, 0.0 }
 0x207   :  { %v263_v59 = vpop.permute.xlu2 %262 }
 0x208   :  { %v268_v60 = vadd.f32 %v263_v59, %v244_v57 }
 0x20a   :  { %v272_v62 = vmax.f32 %v268_v60, 0.0 }
 0x20c   :  { %v278_v0 = vpack.c.bf16 %v272_v62, %v271_v61 }
 0x20e   :  { %302 = vmatpush.bf16.msra.mxu1 %v278_v0  ;;  %608 = vmatpush.bf16.msra.mxu3 %v278_v0 }
 0x20f   :  { %v248_v3 = vpop.permute.xlu2 %247  ;;  %v253_v4 = vpop.permute.xlu1 %252 }
 0x210   :  { %v265_v7 = vadd.f32 %v248_v3, %v241_v1  ;;  %v266_v9 = vadd.f32 %v253_v4, %v242_v2 }
 0x212   :  { %v269_v10 = vmax.f32 %v265_v7, 0.0  ;;  %v270_v11 = vmax.f32 %v266_v9, 0.0 }
 0x214   :  { %v277_v14 = vpack.c.bf16 %v270_v11, %v269_v10 }
 0x216   :  { %303 = vmatpush.bf16.msra.mxu1 %v277_v14  ;;  %609 = vmatpush.bf16.msra.mxu3 %v277_v14 }
 0x219   :  { %598 = vmatmul.msk.bf16.vlgmr.msra.gmra.mxu1 %vm289_vm0, %v606_v12  ;;  %599 = vmatmul.msk.bf16.vlgmr.msra.gmra.mxu3 %vm289_vm0, %v607_v13 }
 0x296   :  { %v848_v6 = vpop.f32.mrf.mxu1 }
 0x297   :  { %v315_v8 = vsel %vm93_vm2, %v848_v6, 0.0  ;;  %v331_v27 = vmul.f32 %v848_v6, %v848_v6 }
 0x298   :  { %316 = vadd.xlane.f32.xlu2 %v315_v8 }
 0x299   :  { %v335_v30 = vsel %vm93_vm2, %v331_v27, 0.0 }
 0x29c   :  { %v852_v15 = vpop.f32.mrf.mxu3 }
 0x29d   :  { %v321_v16 = vsel %vm93_vm2, %v852_v15, 0.0  ;;  %v333_v17 = vmul.f32 %v852_v15, %v852_v15 }
 0x29e   :  { %322 = vadd.xlane.f32.xlu0 %v321_v16  ;;  %v859_v19 = vpop.f32.mrf.mxu1 }
 0x29f   :  { %v341_v18 = vsel %vm93_vm2, %v333_v17, 0.0  ;;  %v318_v25 = vsel %vm93_vm2, %v859_v19, 0.0  ;;  %v332_v26 = vmul.f32 %v859_v19, %v859_v19 }
 0x2a0   :  { %342 = vadd.xlane.f32.xlu1 %v341_v18 }
 0x2a1   :  { %v338_v29 = vsel %vm93_vm2, %v332_v26, 0.0 }
 0x2a4   :  { %v861_v20 = vpop.f32.mrf.mxu3 }
 0x2a5   :  { %v334_v21 = vmul.f32 %v861_v20, %v861_v20  ;;  %v324_v23 = vsel %vm93_vm2, %v861_v20, 0.0 }
 0x2a6   :  { %325 = vadd.xlane.f32.xlu2 %v324_v23 }
 0x2a7   :  { %v344_v24 = vsel %vm93_vm2, %v334_v21, 0.0 }
 0x2a8   :  { %345 = vadd.xlane.f32.xlu0 %v344_v24  ;;  %319 = vadd.xlane.f32.xlu1 %v318_v25 }
 0x2ae   :  { %339 = vadd.xlane.f32.xlu2 %v338_v29 }
 0x2b0   :  { %336 = vadd.xlane.f32.xlu0 %v335_v30 }
 0x30b   :  { %v317_v31 = vpop.xlane.xlu2 %316 }
 0x30c   :  { %v890_v51 = vmul.f32 %v317_v31, %v779_v28 }
 0x30e   :  { %v351_v60 = vmul.f32 %v890_v51, %v890_v51 }
 0x311   :  { %v323_v32 = vpop.xlane.xlu0 %322 }
 0x312   :  { %v329_v34 = vmul.f32 %v323_v32, %v779_v28 }
 0x313   :  { %v343_v35 = vpop.xlane.xlu1 %342 }
 0x314   :  { %v353_v37 = vmul.f32 %v329_v34, %v329_v34  ;;  %v349_v38 = vmul.f32 %v343_v35, %v779_v28 }
 0x316   :  { %v357_v39 = vsub.f32 %v349_v38, %v353_v37 }
 0x318   :  { %v361_v40 = vmax.f32 %v357_v39, 0.0 }
 0x319   :  { %v326_v41 = vpop.xlane.xlu2 %325 }
 0x31a   :  { %v365_v42 = vadd.f32 1e-05, %v361_v40  ;;  %v879_v43 = vmul.f32 %v326_v41, %v779_v28 }
 0x31b   :  { %v346_v47 = vpop.xlane.xlu0 %345  ;;  %v320_v44 = vpop.xlane.xlu1 %319 }
 0x31c   :  { %639 = vrsqrt.f32 %v365_v42  ;;  %v354_v48 = vmul.f32 %v879_v43, %v879_v43  ;;  %v350_v49 = vmul.f32 %v346_v47, %v779_v28  ;;  %v887_v50 = vmul.f32 %v320_v44, %v779_v28 }
 0x31d   :  { %vm393_vm2 = vweird.f32 %v365_v42 }
 0x31e   :  { %v358_v46 = vsub.f32 %v350_v49, %v354_v48  ;;  %v352_v56 = vmul.f32 %v887_v50, %v887_v50  ;;  %v699_v49 = vmov 3  }
 0x31f   :  { %625 = vset.pattern.permute.xlu0 %v699_v49 }
 0x320   :  { %v362_v52 = vmax.f32 %v358_v46, 0.0 }
 0x321   :  { %v340_v53 = vpop.xlane.xlu2 %339 }
 0x322   :  { %v640_v54 = vpop.eup %639  ;;  %v366_v55 = vadd.f32 1e-05, %v362_v52  ;;  %v348_v57 = vmul.f32 %v340_v53, %v779_v28 }
 0x323   :  { %v388_v58 = vmul.f32 %v640_v54, %v365_v42  ;;  %v337_v59 = vpop.xlane.xlu0 %336  ;;  %vm394_vm1 = vweird.f32 %v640_v54 }
 0x324   :  { %641 = vrsqrt.f32 %v366_v55  ;;  %v356_v61 = vsub.f32 %v348_v57, %v352_v56  ;;  %v347_v62 = vmul.f32 %v337_v59, %v779_v28  ;;  %vm395_vm3 = vmor %vm393_vm2, %vm394_vm1  ;;  %vm403_vm5 = vweird.f32 %v366_v55 }
 0x325   :  { %v389_v63 = vmul.f32 %v640_v54, %v388_v58 }
 0x326   :  { %v360_v0 = vmax.f32 %v356_v61, 0.0  ;;  %v355_v1 = vsub.f32 %v347_v62, %v351_v60 }
 0x327   :  { %v390_v2 = vmul.f32 0.5, %v389_v63 }
 0x328   :  { %v364_v3 = vadd.f32 1e-05, %v360_v0  ;;  %v359_v4 = vmax.f32 %v355_v1, 0.0 }
 0x329   :  { %v391_v7 = vsub.f32 1.5, %v390_v2 }
 0x32a   :  { %v642_v9 = vpop.eup %641  ;;  %643 = vrsqrt.f32 %v364_v3  ;;  %v363_v10 = vadd.f32 1e-05, %v359_v4  ;;  %vm383_vm8 = vweird.f32 %v364_v3 }
 0x32b   :  { %v398_v11 = vmul.f32 %v642_v9, %v366_v55  ;;  %v392_v14 = vmul.f32 %v640_v54, %v391_v7  ;;  %vm404_vm4 = vweird.f32 %v642_v9 }
 0x32c   :  { %645 = vrsqrt.f32 %v363_v10  ;;  %vm405_vm6 = vmor %vm403_vm5, %vm404_vm4  ;;  %vm373_vm11 = vweird.f32 %v363_v10 }
 0x32d   :  { %v399_v12 = vmul.f32 %v642_v9, %v398_v11  ;;  %v396_v13 = vsel %vm395_vm3, %v640_v54, %v392_v14  ;;  %v487_v11 = vld [vmem:[%s933_s3] sm:$0x1]  ;;  %s519_s3 = sld [smem:[#allocation2]] }
 0x32e   :  { %v409_v8 = vmul.f32 %v396_v13, %v804_v5 }
 0x32f   :  { %v400_v16 = vmul.f32 0.5, %v399_v12 }
 0x330   :  { %v644_v17 = vpop.eup %643  ;;  %v413_v18 = vmul.f32 %v409_v8, %v329_v34 }
 0x331   :  { %v401_v21 = vsub.f32 1.5, %v400_v16  ;;  %v378_v23 = vmul.f32 %v644_v17, %v364_v3  ;;  %vm384_vm7 = vweird.f32 %v644_v17 }
 0x332   :  { %v646_v24 = vpop.eup %645  ;;  %423 = vrot.lane.b32.xlu1 %v413_v18, %s696_s8  ;;  %vm385_vm10 = vmor %vm383_vm8, %vm384_vm7 }
 0x333   :  { %v379_v25 = vmul.f32 %v644_v17, %v378_v23  ;;  %v368_v26 = vmul.f32 %v646_v24, %v363_v10  ;;  %v402_v27 = vmul.f32 %v642_v9, %v401_v21  ;;  %vm374_vm9 = vweird.f32 %v646_v24 }
 0x334   :  { %vm375_vm12 = vmor %vm373_vm11, %vm374_vm9 }
 0x335   :  { %v380_v29 = vmul.f32 0.5, %v379_v25  ;;  %v369_v30 = vmul.f32 %v646_v24, %v368_v26  ;;  %v406_v31 = vsel %vm405_vm6, %v642_v9, %v402_v27 }
 0x336   :  { %v410_v32 = vmul.f32 %v406_v31, %v811_v22 }
 0x337   :  { %v381_v35 = vsub.f32 1.5, %v380_v29  ;;  %v370_v37 = vmul.f32 0.5, %v369_v30 }
 0x338   :  { %v414_v34 = vmul.f32 %v410_v32, %v879_v43 }
 0x339   :  { %v371_v38 = vsub.f32 1.5, %v370_v37  ;;  %v382_v39 = vmul.f32 %v644_v17, %v381_v35 }
 0x33a   :  { %425 = vrot.lane.b32.xlu0 %v414_v34, %s696_s8  ;;  %447 = vperm.xlu1 %623, %v409_v8  }
 0x33b   :  { %v372_v40 = vmul.f32 %v646_v24, %v371_v38  ;;  %v386_v41 = vsel %vm385_vm10, %v644_v17, %v382_v39  ;;  %v535_v38 = vstv %s601_s19 }
 0x33c   :  { %v408_v42 = vmul.f32 %v386_v41, %v824_v36 }
 0x33d   :  { %v376_v47 = vsel %vm375_vm12, %v646_v24, %v372_v40 }
 0x33e   :  { %v407_v44 = vmul.f32 %v376_v47, %v818_v33  ;;  %v412_v43 = vmul.f32 %v408_v42, %v887_v50 }
 0x340   :  { %v411_v48 = vmul.f32 %v407_v44, %v890_v51 }
 0x342   :  { %419 = vrot.lane.b32.xlu2 %v411_v48, %s696_s8  ;;  %421 = vrot.lane.b32.xlu0 %v412_v43, %s696_s8 }
 0x343   :  { %626 = vset.pattern.permute.xlu1 %v699_v49 }
 0x34a   :  { %452 = vperm.xlu2 %624, %v410_v32   ;;  %v531_v32 = vstv %s519_s3 }
 0x352   :  { %437 = vperm.xlu2 %624, %v407_v44  }
 0x35a   :  { %628 = vset.pattern.permute.xlu2 %v699_v49 }
 0x39c   :  { %v420_v46 = vpop.permute.xlu2 %419 }
 0x39d   :  { %v431_v52 = vsub.f32 %v818_v33, %v420_v46 }
 0x39f   :  { %461 = vperm.xlu2 %628, %v431_v52  }
 0x3a4   :  { %v424_v53 = vpop.permute.xlu1 %423  ;;  %v453_v57 = vpop.permute.xlu2 %452 }
 0x3a5   :  { %v433_v54 = vsub.f32 %v804_v5, %v424_v53  ;;  %v458_v60 = vmul.f32 %v453_v57, %v861_v20 }
 0x3a7   :  { %471 = vperm.xlu0 %625, %v433_v54  }
 0x3ac   :  { %v426_v51 = vpop.permute.xlu0 %425  ;;  %v448_v58 = vpop.permute.xlu1 %447 }
 0x3ad   :  { %v434_v50 = vsub.f32 %v811_v22, %v426_v51  ;;  %v457_v33 = vmul.f32 %v448_v58, %v852_v15  ;;  %v438_v5 = vpop.permute.xlu2 %437 }
 0x3af   :  { %476 = vperm.xlu1 %626, %v434_v50  }
 0x3b4   :  { %v422_v55 = vpop.permute.xlu0 %421 }
 0x3b5   :  { %v432_v56 = vsub.f32 %v824_v36, %v422_v55  ;;  %v455_v36 = vmul.f32 %v438_v5, %v848_v6 }
 0x3b7   :  { %627 = vset.pattern.permute.xlu1 %v698_v45  ;;  %466 = vperm.xlu0 %625, %v432_v56  }
 0x3b8   :  { %442 = vperm.xlu1 %627, %v408_v42  }
 0x3f9   :  { %v462_v2 = vpop.permute.xlu2 %461 }
 0x3fa   :  { %v479_v3 = vadd.f32 %v462_v2, %v455_v36 }
 0x3fc   :  { %v483_v15 = vmax.f32 %v479_v3, 0.0 }
 0x419   :  { %v472_v59 = vpop.permute.xlu0 %471 }
 0x41a   :  { %v481_v61 = vadd.f32 %v472_v59, %v457_v33 }
 0x41c   :  { %v485_v22 = vmax.f32 %v481_v61, 0.0 }
 0x421   :  { %v477_v62 = vpop.permute.xlu1 %476 }
 0x422   :  { %v482_v63 = vadd.f32 %v477_v62, %v458_v60 }
 0x424   :  { %v486_v0 = vmax.f32 %v482_v63, 0.0 }
 0x426   :  { %v489_v1 = vpack.c.bf16 %v486_v0, %v485_v22 }
 0x428   :  { %499 = vmatpush.bf16.msra.mxu2 %v489_v1 }
 0x429   :  { %v467_v7 = vpop.permute.xlu0 %466 }
 0x42a   :  { %v443_v45 = vpop.permute.xlu1 %442 }
 0x42b   :  { %v456_v4 = vmul.f32 %v443_v45, %v859_v19 }
 0x42d   :  { %v480_v9 = vadd.f32 %v467_v7, %v456_v4 }
 0x42f   :  { %v484_v10 = vmax.f32 %v480_v9, 0.0 }
 0x431   :  { %v488_v20 = vpack.c.bf16 %v484_v10, %v483_v15 }
 0x433   :  { %500 = vmatpush.bf16.msra.mxu2 %v488_v20 }
 0x436   :  { %600 = vmatmul.msk.bf16.vlgmr.msra.gmra.mxu2 %vm289_vm0, %v487_v11 }
 0x4b9   :  { %v502_v14 = vpop.f32.mrf.mxu2 }
 0x4ba   :  { %v507_v6 = vsel %vm506_vm13, %v502_v14, 0.0  ;;  %v511_v12 = vmul.f32 %v502_v14, %v502_v14 }
 0x4bb   :  { %508 = vadd.xlane.f32.xlu1 %v507_v6 }
 0x4bc   :  { %v512_v19 = vsel %vm506_vm13, %v511_v12, 0.0 }
 0x4bd   :  { %513 = vadd.xlane.f32.xlu2 %v512_v19 }
 0x4c1   :  { %v504_v13 = vpop.f32.mrf.mxu2 }
 0x52e   :  { %v509_v8 = vpop.xlane.xlu1 %508 }
 0x52f   :  { %v510_v16 = vmul.f32 %v509_v8, %v779_v28 }
 0x530   :  { %v514_v17 = vpop.xlane.xlu2 %513 }
 0x531   :  { %v516_v18 = vmul.f32 %v510_v16, %v510_v16  ;;  %v515_v21 = vmul.f32 %v514_v17, %v779_v28 }
 0x533   :  { %v517_v23 = vsub.f32 %v515_v21, %v516_v18 }
 0x535   :  { %v518_v24 = vmax.f32 %v517_v23, 0.0 }
 0x537   :  { %v520_v25 = vadd.f32 1e-05, %v518_v24 }
 0x539   :  { %647 = vrsqrt.f32 %v520_v25  ;;  %vm527_vm15 = vweird.f32 %v520_v25 }
 0x53f   :  { %v648_v26 = vpop.eup %647 }
 0x540   :  { %v522_v27 = vmul.f32 %v648_v26, %v520_v25  ;;  %vm528_vm14 = vweird.f32 %v648_v26 }
 0x541   :  { %vm529_vm0 = vmor %vm527_vm15, %vm528_vm14 }
 0x542   :  { %v523_v29 = vmul.f32 %v648_v26, %v522_v27 }
 0x544   :  { %v524_v30 = vmul.f32 0.5, %v523_v29 }
 0x546   :  { %v525_v31 = vsub.f32 1.5, %v524_v30 }
 0x548   :  { %v526_v35 = vmul.f32 %v648_v26, %v525_v31 }
 0x54a   :  { %v530_v37 = vsel %vm529_vm0, %v648_v26, %v526_v35 }
 0x54b   :  { %v532_v34 = vmul.f32 %v531_v32, %v530_v37 }
 0x54d   :  { %v534_v28 = vmul.f32 %v532_v34, %v510_v16  ;;  %v537_v40 = vmul.f32 %v532_v34, %v502_v14 }
 0x54f   :  { %v536_v39 = vsub.f32 %v535_v38, %v534_v28 }
 0x551   :  { %v538_v41 = vadd.f32 %v537_v40, %v536_v39 }
 0x553   :  { %v602_v42 = vmul.f32 -1.442695, %v538_v41 }
 0x555   :  { %649 = vpow2.f32 %v602_v42 }
 0x55b   :  { %v650_v47 = vpop.eup %649 }
 0x55c   :  { %v542_v44 = vadd.f32 1.0, %v650_v47 }
 0x55e   :  { %651 = vrcp.f32 %v542_v44  ;;  %v554_v46 = vand.u32 2147483648, %v542_v44  ;;  %v552_v53 = vand.u32 2147483647, %v542_v44  ;;  %vm548_vm2 = vweird.f32 %v542_v44 }
 0x560   :  { %v555_v51 = vor.u32 1.1754944e-38, %v554_v46  ;;  %vm553_vm4 = vcmp.eq.f32.partialorder %v552_v53, 8.507059e+37 }
 0x564   :  { %v652_v48 = vpop.eup %651 }
 0x565   :  { %v544_v43 = vmul.f32 %v652_v48, %v542_v44  ;;  %vm549_vm1 = vweird.f32 %v652_v48 }
 0x566   :  { %vm550_vm3 = vmor %vm548_vm2, %vm549_vm1 }
 0x567   :  { %v545_v49 = vsub.f32 1.0, %v544_v43 }
 0x569   :  { %v546_v52 = vmul.f32 %v652_v48, %v545_v49 }
 0x56b   :  { %v547_v54 = vadd.f32 %v652_v48, %v546_v52 }
 0x56d   :  { %v551_v50 = vsel %vm550_vm3, %v652_v48, %v547_v54 }
 0x56e   :  { %v556_v55 = vsel %vm553_vm4, %v555_v51, %v551_v50 }
 0x56f   :  { %558 = vst.msk [vmem:[#allocation5] sm:$0x1] %vm506_vm13, %v556_v55 }
 0x570   :  { %569 = dma.vmem_to_hbm [thread:$0]  %s565_s21, 16, %s567_s24, [#allocation3]  }
 0x571   :  { %691 = dma.done.wait [#allocation3], 16  }
 0x572   :  { %692 = vsyncadd [#allocation3], 4294967280 }
 0x573   :  { %574 = vsyncpa [#allocation3], 1 }
 0x574   :  { %575 = vsyncpa [#allocation4], 1 }

</bundles_post_ra>
